<compile_context>
chip_gen: v6e
topology: v6e:2x2x1
jax: 0.10.0
libtpu: 0.0.40
codegen_flags: <defaults>
</compile_context>

<pallas_src>
import functools

import jax
import jax.numpy as jnp
from jax.experimental import pallas as pl
from jax.experimental.pallas import tpu as pltpu


def _lsce_kernel(ignore_index, n_rows, tile_n,
                 logits_ref, target_ref, out_ref):
    x = logits_ref[...].astype(jnp.float32)                   # (TILE_N, C)
    c = x.shape[-1]

    # Numerically stable log-sum-exp along the class (lane) axis.
    m = jnp.max(x, axis=-1, keepdims=True)                    # (TILE_N, 1)
    lse = jnp.log(jnp.sum(jnp.exp(x - m), axis=-1, keepdims=True))
    logz = m + lse                                             # (TILE_N, 1)

    # Algebraic rewrite (no materialized log_preds = x - logz):
    #   -sum_j log_preds[i, j] = C * logz_i - sum_j x[i, j]
    #   -log_preds[i, t_i]     = logz_i - x[i, t_i]
    # TODO(synk): if a bundle dump shows the 2-unit XLU as the binding slot on
    # v6e/v7x, move these class-axis sums onto the idle MXU (matmul against a
    # constant ones matrix, preferred_element_type=f32), keeping only the row
    # max on the XLU.
    sum_x = jnp.sum(x, axis=-1, keepdims=True)                 # (TILE_N, 1)
    row_smooth = c * logz - sum_x                              # (TILE_N, 1)

    tgt = target_ref[...]                                      # (TILE_N, 1) i32
    cols = jax.lax.broadcasted_iota(jnp.int32, x.shape, 1)     # (TILE_N, C)
    picked_x = jnp.sum(jnp.where(cols == tgt, x, 0.0),
                       axis=-1, keepdims=True)                 # (TILE_N, 1)
    nll_i = logz - picked_x                                    # (TILE_N, 1)

    # Mask rows past the (possibly ragged) end of the array and ignored
    # targets.  The last grid block may read unspecified rows from its
    # partially-filled VMEM buffer; the selects below keep that garbage (even
    # NaN) from reaching the outputs.  The smoothing term keeps ALL real rows
    # (matches PyTorch: ignore_index only affects the NLL term).
    row0 = pl.program_id(0) * tile_n
    rows = row0 + jax.lax.broadcasted_iota(jnp.int32, (tile_n, 1), 0)
    in_range = rows < n_rows
    valid = (tgt != ignore_index) & in_range

    block_smooth = jnp.sum(jnp.where(in_range, row_smooth, 0.0))   # f32 scalar
    block_nll = jnp.sum(jnp.where(valid, nll_i, 0.0))              # f32 scalar

    # Pack both per-block partials into a single (1, 8, 128) store:
    #   [0, 0, 0] = smooth partial, [0, 0, 1] = nll partial, zeros elsewhere.
    subs = jax.lax.broadcasted_iota(jnp.int32, (1, 8, 128), 1)
    lanes = jax.lax.broadcasted_iota(jnp.int32, (1, 8, 128), 2)
    first_row = subs == 0
    out_ref[...] = jnp.where(first_row & (lanes == 0), block_smooth,
                             jnp.where(first_row & (lanes == 1), block_nll,
                                       0.0))


def _vmem_capacity_bytes():
    try:
        cap = int(pltpu.get_tpu_info().vmem_capacity_bytes)
        if cap > 0:
            return cap
    except Exception:
        pass
    return 64 * 1024 * 1024          # v7x per-TensorCore floor


def _choose_tile_n(n, c, itemsize):
    # Row granularity matches native sublane packing of the streamed dtype
    # (f32: 8 rows, bf16: 16, int8/fp8: 32).
    gran = {4: 8, 2: 16, 1: 32}.get(itemsize, 8)
    vmem_cap = _vmem_capacity_bytes()
    # Per-step footprint target: comfortably inside per-TC VMEM (64 MiB on
    # v7x, 128 MiB on v5e/v6e), leaving headroom for compiler scratch and the
    # double-buffered output tiles.
    budget = min(int(vmem_cap * 0.6), 40 * 1024 * 1024)
    # Per-row bytes: double-buffered streamed logits block + lane-padded
    # (x, 1) target block + ~4 full-width f32 temporaries inside the body
    # (f32 cast of x, exp(x - m), int32 class iota, where-select).
    per_row = 2 * c * itemsize + 2 * 128 * 4 + 4 * c * 4
    t = max(gran, budget // per_row)
    t = max(gran, (t // gran) * gran)
    n_ceil = -(-n // gran) * gran
    t = min(t, n_ceil)
    # Prefer >= 2 blocks so both TensorCores get work on v7x megacore.
    if t >= n and n > gran:
        half = -(-((n + 1) // 2) // gran) * gran
        t = max(gran, min(t, half))
    # TODO(synk): vocab-scale C where even a `gran`-row block exceeds VMEM
    # would need class-axis tiling (two-level log-sum-exp); not wired up.
    return max(gran, t)


def label_smoothing_cross_entropy(output, target, *, eps=0.1,
                                  reduction="mean", ignore_index=-100,
                                  tile_n=None):
    """output: (N, C) float logits (f32 or bf16); target: (N,) int class ids."""
    n, c = output.shape
    itemsize = jnp.dtype(output.dtype).itemsize
    gran = {4: 8, 2: 16, 1: 32}.get(itemsize, 8)
    if tile_n is None:
        tile_n = _choose_tile_n(n, c, itemsize)
    tile_n = max(gran, (tile_n // gran) * gran)

    num_blocks = pl.cdiv(n, tile_n)

    tgt2d = target.astype(jnp.int32).reshape(n, 1)

    kernel = functools.partial(_lsce_kernel, ignore_index, n, tile_n)

    vmem_cap = _vmem_capacity_bytes()
    footprint = (tile_n * (2 * c * itemsize + 2 * 128 * 4 + 4 * c * 4)
                 + 2 * 8 * 128 * 4            # double-buffered output tiles
                 + (2 << 20))                 # margin
    vmem_limit = int(min(0.85 * vmem_cap, max(footprint, 16 << 20)))

    cost = pl.CostEstimate(
        flops=6 * n * c,
        transcendentals=n * c,
        bytes_accessed=n * c * itemsize + n * 4 + num_blocks * 8 * 128 * 4,
    )

    # NOTE: if a v7x profile shows exposed DMA after tile sizing, add
    # pipeline_mode=pl.Buffered(3) on the logits BlockSpec (VMEM permitting).
    partials = pl.pallas_call(
        kernel,
        out_shape=jax.ShapeDtypeStruct((num_blocks, 8, 128), jnp.float32),
        grid_spec=pltpu.PrefetchScalarGridSpec(
            num_scalar_prefetch=0,
            grid=(num_blocks,),
            in_specs=[
                pl.BlockSpec((tile_n, c), lambda i: (i, 0)),
                pl.BlockSpec((tile_n, 1), lambda i: (i, 0)),
            ],
            out_specs=pl.BlockSpec((1, 8, 128), lambda i: (i, 0, 0)),
        ),
        compiler_params=pltpu.CompilerParams(
            dimension_semantics=("parallel",),
            vmem_limit_bytes=vmem_limit,
        ),
        cost_estimate=cost,
    )(output, tgt2d)

    # Tiny epilogue: one per-block partial per term.
    smooth_sum = jnp.sum(partials[:, 0, 0])
    nll_sum = jnp.sum(partials[:, 0, 1])
    # Exact integer count of non-ignored rows from the original target.
    count = jnp.sum((target != ignore_index).astype(jnp.int32))

    if reduction == "sum":
        smooth = smooth_sum
        nll = nll_sum
    elif reduction == "mean":
        smooth = smooth_sum / n                       # mean over ALL rows
        # Matches PyTorch F.nll_loss: divide by number of non-ignored rows
        # (yields NaN if every target is ignored, same as PyTorch).
        nll = nll_sum / count.astype(jnp.float32)
    else:
        # TODO(synk): reduction='none' would need per-row outputs surfaced.
        raise NotImplementedError(reduction)

    return smooth * eps / c + (1.0 - eps) * nll


def _reference(output, target, eps=0.1, reduction="mean", ignore_index=-100):
    # pure-JAX reference for a sanity check
    log_preds = jax.nn.log_softmax(output.astype(jnp.float32), axis=-1)
    n, c = output.shape
    valid = target != ignore_index
    safe_t = jnp.clip(target, 0, c - 1).reshape(n, 1)
    picked = -jnp.take_along_axis(log_preds, safe_t, axis=1)[:, 0]
    picked = jnp.where(valid, picked, 0.0)
    if reduction == "sum":
        smooth = -jnp.sum(log_preds)
        nll = jnp.sum(picked)
    else:
        smooth = jnp.mean(-jnp.sum(log_preds, axis=-1))
        nll = jnp.sum(picked) / jnp.sum(valid)
    return smooth * eps / c + (1.0 - eps) * nll


if __name__ == "__main__":
    key = jax.random.PRNGKey(0)
    k1, k2 = jax.random.split(key)

    # N deliberately NOT a multiple of the row tile to exercise the ragged
    # last block (no host-side padding anywhere).
    N, C = 20, 128
    logits = jax.random.normal(k1, (N, C), dtype=jnp.float32)
    target = jax.random.randint(k2, (N,), 0, C, dtype=jnp.int32)
    target = target.at[3].set(-100)      # exercise ignore_index
    target = target.at[11].set(-100)

    # mean reduction, multi-block grid (tile_n=8 -> 3 grid steps, last block
    # has 4 out-of-range rows masked inside the kernel).
    loss = jax.block_until_ready(
        label_smoothing_cross_entropy(logits, target, tile_n=8))
    ref = _reference(logits, target)
    assert jnp.allclose(loss, ref, rtol=1e-5, atol=1e-5), (loss, ref)

    # auto tile selection (generation-aware; >= 2 blocks preferred)
    loss_auto = jax.block_until_ready(
        label_smoothing_cross_entropy(logits, target))
    assert jnp.allclose(loss_auto, ref, rtol=1e-5, atol=1e-5), (loss_auto, ref)

    # sum reduction
    loss_sum = jax.block_until_ready(
        label_smoothing_cross_entropy(logits, target, reduction="sum",
                                      tile_n=8))
    ref_sum = _reference(logits, target, reduction="sum")
    assert jnp.allclose(loss_sum, ref_sum, rtol=1e-5, atol=1e-5), (loss_sum,
                                                                   ref_sum)

    # bf16 logits streamed directly (cast to f32 inside the kernel); checked
    # against a reference computed on the same bf16-quantized inputs.
    logits_bf16 = logits.astype(jnp.bfloat16)
    loss_bf16 = jax.block_until_ready(
        label_smoothing_cross_entropy(logits_bf16, target, tile_n=16))
    ref_bf16 = _reference(logits_bf16, target)
    assert jnp.allclose(loss_bf16, ref_bf16, rtol=1e-4, atol=1e-4), (loss_bf16,
                                                                     ref_bf16)

    print("KERNEL_OK")
</pallas_src>

<mosaic_0001>
module attributes {stable_mosaic.version = 11 : i64} {
  func.func @_lsce_kernel(%arg0: i32, %arg1: memref<8x128xf32, #tpu.memory_space<vmem>>, %arg2: memref<8x1xi32, #tpu.memory_space<vmem>>, %arg3: memref<1x8x128xf32, #tpu.memory_space<vmem>>) attributes {dimension_semantics = [#tpu.dimension_semantics<parallel>], iteration_bounds = array<i64: 3>, scalar_prefetch = 0 : i64, scratch_operands = 0 : i64, tpu.core_type = #tpu.core_type<tc>, window_params = [{transform_indices = @transform_0, window_bounds = array<i64: 8, 128>}, {transform_indices = @transform_1, window_bounds = array<i64: 8, 1>}, {transform_indices = @transform_2, window_bounds = array<i64: 1, 8, 128>}]} {
    %c0 = arith.constant 0 : index
    %c0_0 = arith.constant 0 : index
    %0 = vector.load %arg1[%c0, %c0_0] : memref<8x128xf32, #tpu.memory_space<vmem>>, vector<8x128xf32>
    %cst = arith.constant dense<0xFF800000> : vector<8xf32>
    %1 = vector.multi_reduction <maximumf>, %0, %cst [1] : vector<8x128xf32> to vector<8xf32>
    %2 = vector.shape_cast %1 : vector<8xf32> to vector<8x1xf32>
    %3 = vector.broadcast %2 : vector<8x1xf32> to vector<8x128xf32>
    %4 = arith.subf %0, %3 : vector<8x128xf32>
    %5 = math.exp %4 : vector<8x128xf32>
    %cst_1 = arith.constant dense<0.000000e+00> : vector<8xf32>
    %6 = vector.multi_reduction <add>, %5, %cst_1 [1] : vector<8x128xf32> to vector<8xf32>
    %7 = vector.shape_cast %6 : vector<8xf32> to vector<8x1xf32>
    %8 = math.log %7 : vector<8x1xf32>
    %9 = arith.addf %2, %8 : vector<8x1xf32>
    %cst_2 = arith.constant dense<0.000000e+00> : vector<8xf32>
    %10 = vector.multi_reduction <add>, %0, %cst_2 [1] : vector<8x128xf32> to vector<8xf32>
    %11 = vector.shape_cast %10 : vector<8xf32> to vector<8x1xf32>
    %cst_3 = arith.constant 1.280000e+02 : f32
    %12 = vector.broadcast %cst_3 : f32 to vector<8x1xf32>
    %13 = arith.mulf %12, %9 : vector<8x1xf32>
    %14 = arith.subf %13, %11 : vector<8x1xf32>
    %c0_4 = arith.constant 0 : index
    %c0_5 = arith.constant 0 : index
    %15 = vector.load %arg2[%c0_4, %c0_5] : memref<8x1xi32, #tpu.memory_space<vmem>>, vector<8x1xi32>
    %16 = tpu.iota {dimensions = array<i32: 1>} : vector<8x128xi32>
    %17 = vector.broadcast %15 : vector<8x1xi32> to vector<8x128xi32>
    %18 = arith.cmpi eq, %16, %17 : vector<8x128xi32>
    %cst_6 = arith.constant 0.000000e+00 : f32
    %19 = vector.broadcast %cst_6 : f32 to vector<8x128xf32>
    %20 = arith.select %18, %0, %19 : vector<8x128xi1>, vector<8x128xf32>
    %cst_7 = arith.constant dense<0.000000e+00> : vector<8xf32>
    %21 = vector.multi_reduction <add>, %20, %cst_7 [1] : vector<8x128xf32> to vector<8xf32>
    %22 = vector.shape_cast %21 : vector<8xf32> to vector<8x1xf32>
    %23 = arith.subf %9, %22 : vector<8x1xf32>
    %c8_i32 = arith.constant 8 : i32
    %24 = arith.muli %arg0, %c8_i32 : i32
    %25 = tpu.iota {dimensions = array<i32: 0>} : vector<8x1xi32>
    %26 = vector.broadcast %24 : i32 to vector<8x1xi32>
    %27 = arith.addi %26, %25 : vector<8x1xi32>
    %c20_i32 = arith.constant 20 : i32
    %28 = vector.broadcast %c20_i32 : i32 to vector<8x1xi32>
    %29 = arith.cmpi slt, %27, %28 : vector<8x1xi32>
    %c-100_i32 = arith.constant -100 : i32
    %30 = vector.broadcast %c-100_i32 : i32 to vector<8x1xi32>
    %31 = arith.cmpi ne, %15, %30 : vector<8x1xi32>
    %32 = arith.andi %31, %29 : vector<8x1xi1>
    %cst_8 = arith.constant 0.000000e+00 : f32
    %33 = vector.broadcast %cst_8 : f32 to vector<8x1xf32>
    %34 = arith.select %29, %14, %33 : vector<8x1xi1>, vector<8x1xf32>
    %35 = vector.shape_cast %34 : vector<8x1xf32> to vector<1x8x1xf32>
    %cst_9 = arith.constant dense<0.000000e+00> : vector<1xf32>
    %36 = vector.multi_reduction <add>, %35, %cst_9 [1, 2] : vector<1x8x1xf32> to vector<1xf32>
    %37 = vector.shape_cast %36 : vector<1xf32> to vector<1x1x1xf32>
    %38 = vector.extract %37[0, 0, 0] : f32 from vector<1x1x1xf32>
    %cst_10 = arith.constant 0.000000e+00 : f32
    %39 = vector.broadcast %cst_10 : f32 to vector<8x1xf32>
    %40 = arith.select %32, %23, %39 : vector<8x1xi1>, vector<8x1xf32>
    %41 = vector.shape_cast %40 : vector<8x1xf32> to vector<1x8x1xf32>
    %cst_11 = arith.constant dense<0.000000e+00> : vector<1xf32>
    %42 = vector.multi_reduction <add>, %41, %cst_11 [1, 2] : vector<1x8x1xf32> to vector<1xf32>
    %43 = vector.shape_cast %42 : vector<1xf32> to vector<1x1x1xf32>
    %44 = vector.extract %43[0, 0, 0] : f32 from vector<1x1x1xf32>
    %45 = tpu.iota {dimensions = array<i32: 1>} : vector<1x8x128xi32>
    %46 = tpu.iota {dimensions = array<i32: 2>} : vector<1x8x128xi32>
    %c0_i32 = arith.constant 0 : i32
    %47 = vector.broadcast %c0_i32 : i32 to vector<1x8x128xi32>
    %48 = arith.cmpi eq, %45, %47 : vector<1x8x128xi32>
    %c0_i32_12 = arith.constant 0 : i32
    %49 = vector.broadcast %c0_i32_12 : i32 to vector<1x8x128xi32>
    %50 = arith.cmpi eq, %46, %49 : vector<1x8x128xi32>
    %51 = arith.andi %48, %50 : vector<1x8x128xi1>
    %c1_i32 = arith.constant 1 : i32
    %52 = vector.broadcast %c1_i32 : i32 to vector<1x8x128xi32>
    %53 = arith.cmpi eq, %46, %52 : vector<1x8x128xi32>
    %54 = arith.andi %48, %53 : vector<1x8x128xi1>
    %cst_13 = arith.constant 0.000000e+00 : f32
    %55 = vector.broadcast %44 : f32 to vector<1x8x128xf32>
    %56 = vector.broadcast %cst_13 : f32 to vector<1x8x128xf32>
    %57 = arith.select %54, %55, %56 : vector<1x8x128xi1>, vector<1x8x128xf32>
    %58 = vector.broadcast %38 : f32 to vector<1x8x128xf32>
    %59 = arith.select %51, %58, %57 : vector<1x8x128xi1>, vector<1x8x128xf32>
    %c0_14 = arith.constant 0 : index
    %c0_15 = arith.constant 0 : index
    %c0_16 = arith.constant 0 : index
    %60 = vector.load %arg3[%c0_14, %c0_15, %c0_16] : memref<1x8x128xf32, #tpu.memory_space<vmem>>, vector<1x8x128xf32>
    tpu.vector_store %arg3[%c0_14, %c0_15, %c0_16], %59 {strides = array<i32>} : memref<1x8x128xf32, #tpu.memory_space<vmem>>, vector<1x8x128xf32>,
    return
  }
  func.func @transform_0(%arg0: i32) -> (i32, i32) {
    %c0_i32 = arith.constant 0 : i32
    %c0_i32_0 = arith.constant 0 : i32
    return %arg0, %c0_i32 : i32, i32
  }
  func.func @transform_1(%arg0: i32) -> (i32, i32) {
    %c0_i32 = arith.constant 0 : i32
    %c0_i32_0 = arith.constant 0 : i32
    return %arg0, %c0_i32 : i32, i32
  }
  func.func @transform_2(%arg0: i32) -> (i32, i32, i32) {
    %c0_i32 = arith.constant 0 : i32
    %c0_i32_0 = arith.constant 0 : i32
    %c0_i32_1 = arith.constant 0 : i32
    return %arg0, %c0_i32, %c0_i32_0 : i32, i32, i32
  }
}

</mosaic_0001>

<bundles_post_ra>
// kernel: tpu_custom_call.1
= control target key start
LH: loop header
LB: loop body
LE: loop exit
PB: predicated region body
PF: predicated region fallthrough
CT: control target
= control target key end

     0   :  { %7 = vsyncpa [#allocation3], 0  ;;  %s545_s0 = inlined_call_operand.vmem [shape: f32[20,128], index: 0, kind: input, shape index: {}]   ;;  %s546_s1 = inlined_call_operand.vmem [shape: s32[20,1], index: 1, kind: input, shape index: {}]   ;;  %s547_s2 = inlined_call_operand.hbm [shape: f32[3,8,128], index: 2, kind: output, shape index: {}]  }
   0x1   :  { %9 = vsyncpa [#allocation3 + $0x1], 0  ;;  %s448_s9 = smov 0   ;;  %s450_s10 = smov 0  }
   0x2   :  { %s452_s11 = smov 0   ;;  %s454_s12 = smov 0  }
   0x3 LB: > { %s469_s13 = sadd.s32 4294967295, %s429_s12   ;;  %s308_s14 = sadd.s32 4294967294, %s429_s12   ;;  %s429_s12 = sphi %s454_s12, %s553_s12   ;;  %s425_s11 = sphi %s452_s11, %s552_s11   ;;  %s421_s10 = sphi %s450_s10, %s551_s10   ;;  %s417_s9 = sphi %s448_s9, %s550_s9  }
   0x4   : > { %s473_s15 = sadd.s32 1, %s429_s12   ;;  %s74_s16 = sadd.s32 1, %s425_s11 }
   0x5   : > { %s71_s17 = ssub.s32 %s429_s12, %s473_s15  ;;  %p84_p0 = scmp.ne.s32.totalorder %s425_s11, %s421_s10 }
   0x6   : > { %p72_p1 = scmp.eq.s32.totalorder %s71_s17, 0  ;;  %p85_p2 = scmp.eq.s32.totalorder %s469_s13, 2 }
   0x7   : > { %p90_p3 = scmp.ne.s32.totalorder %s421_s10, %s417_s9  ;;  %p91_p4 = scmp.eq.s32.totalorder %s308_s14, 2 }
   0x8   : > { %s484_s18 = scalar_select %p72_p1, %s425_s11, %s74_s16  }
   0x9   : > { %p486_p5 = por %p85_p2, %p84_p0  ;;  %p490_p6 = por %p91_p4, %p90_p3 }
   0xa   : > { %p311_p7 = scmp.ge.s32.totalorder %s429_s12, 1  ;;  %p123_p8 = scmp.lt.s32.totalorder %s429_s12, 4 }
   0xc   : > { %p124_p9 = pnand %p311_p7, %p123_p8 }
   0xd   : > { %p148_p10 = scmp.lt.s32.totalorder (!%p124_p9), %s469_s13, 2  ;;  %s315_s29 = sshll.u32 (!%p124_p9), %s469_s13, 3 }
   0xe   : > { %127 = sbr.rel (%p124_p9) target bundleno = 562 (0x232), region = 28  ;;  %s145_s30 = sand.u32 (!%p124_p9), 1, %s421_s10  }
   0xf   : > { %s312_s3 = sshll.u32 (!%p124_p9), %s145_s30, 3  ;;  %s317_s4 = sshll.u32 (!%p124_p9), %s469_s13, 7 }
  0x10   : > { %s147_s6 = scalar_lea.vmem (!%p124_p9), [#allocation2], %s312_s3  ;;  %s510_s17 = scalar_lea.hbm (!%p124_p9), %s547_s2, %s317_s4 }
  0x11   : > { %s237_s7 = sshll.u32 (!%p124_p9), %s147_s6, 4  ;;  %s238_s7 = int_to_ptr.vmem [resolvable:$true] %s237_s7 }
  0x13   : > { %v431_v0 = vmov 0   ;;  %s149_s21 = scalar_select %p148_p10, %s469_s13, 2  ;;  %v172_v6 = vlaneseq  ;;  %v185_v14 = vstv %s315_s29  ;;  %vm191_vm4 = vcmask 7168  }
  0x14   : > { %364 = vset.pattern.permute.xlu0 %v431_v0  ;;  %s369_s13 = scalar_lea.vmem %s238_s7, 128 }
  0x15   : > { %s313_s22 = sshll.u32 %s149_s21, 3  ;;  %v173_v7 = vand.u32 127, %v172_v6  ;;  %v184_v12 = vshrl.u32 %v172_v6, 7  ;;  %s224_s21 = scalar_lea.sflag [#allocation3], %s145_s30 }
  0x16   : > { %s151_s25 = scalar_lea.vmem %s545_s0, %s313_s22  ;;  %s155_s28 = scalar_lea.vmem %s546_s1, %s313_s22 }
  0x17   : > { %v156_v1 = vld [vmem:[%s151_s25] sm:$0xff]  ;;  %v186_v17 = vadd.s32 %v185_v14, %v184_v12  ;;  %vm213_vm5 = vcmp.eq.s32.totalorder %v184_v12, 0  ;;  %vm216_vm6 = vcmp.eq.s32.totalorder %v173_v7, 1  ;;  %vm214_vm7 = vcmp.eq.s32.totalorder %v173_v7, 0  ;;  %p370_p11 = scmp.ne.s32.totalorder %s238_s7, %s369_s13  ;;  %s432_s22 = smov [#allocation2]  }
  0x18   : > { %157 = vmax.xlane.f32.xlu0 %v156_v1  ;;  %v171_v2 = vld [vmem:[%s155_s28] sm:$0xff]  ;;  %vm217_vm8 = vmand %vm213_vm5, %vm216_vm6  ;;  %s373_s23 = sshll.u32 %s432_s22, 4  ;;  %s374_s23 = int_to_ptr.vmem [resolvable:$false] %s373_s23 }
  0x19   : > { %vm188_vm1 = vcmp.ne.s32.totalorder %v171_v2, 4294967196  ;;  %vm187_vm2 = vcmp.lt.s32.totalorder %v186_v17, 20  ;;  %vm215_vm9 = vmand %vm213_vm5, %vm214_vm7  ;;  %p371_p12 = pnand %p370_p11, %p486_p5  ;;  %s375_s24 = scalar_lea.vmem %s374_s23, 256 }
  0x1a   : > { %vm189_vm3 = vmand %vm188_vm1, %vm187_vm2  ;;  %p376_p0 = scmp.lt.s32.totalorder %s238_s7, %s374_s23  ;;  %p377_p1 = scmp.lt.s32.totalorder %s375_s24, %s369_s13 }
  0x1b   : > { %p372_p13 = pneg %p371_p12 }
  0x1c   : > { %p378_p2 = por %p377_p1, %p376_p0 }
  0x1e   : > { %p379_p3 = pnand %p378_p2, %p372_p13 }
  0x2e   : > { %175 = vperm.xlu0 %364, %v171_v2  }
  0xa1   : > { %v158_v3 = vpop.xlane.xlu0 %157 }
  0xa2   : > { %v159_v4 = vsub.f32 %v156_v1, %v158_v3 }
  0xa4   : > { %v160_v5 = vmul.f32 1.442695, %v159_v4 }
  0xa6   : > { %365 = vpow2.f32 %v160_v5 }
  0xa9   : > { %v176_v9 = vpop.permute.xlu0 %175 }
  0xaa   : > { %vm177_vm0 = vcmp.eq.s32.totalorder %v173_v7, %v176_v9 }
  0xab   : > { %v178_v10 = vsel %vm177_vm0, %v156_v1, 0.0 }
  0xb3   : > { %v366_v8 = vpop.eup %365 }
  0xb4   : > { %162 = vadd.xlane.f32.xlu1 %v366_v8 }
  0xb8   : > { %167 = vadd.xlane.f32.xlu1 %v156_v1 }
  0xbc   : > { %179 = vadd.xlane.f32.xlu1 %v178_v10 }
 0x13d   : > { %v163_v11 = vpop.xlane.xlu1 %162 }
 0x13e   : > { %367 = vlog2.f32 %v163_v11 }
 0x141   : > { %v168_v13 = vpop.xlane.xlu1 %167 }
 0x145   : > { %v180_v19 = vpop.xlane.xlu1 %179 }
 0x14b   : > { %v368_v15 = vpop.eup %367 }
 0x14c   : > { %v165_v16 = vmul.f32 0.6931472, %v368_v15 }
 0x14e   : > { %v166_v18 = vadd.f32 %v165_v16, %v158_v3 }
 0x150   : > { %v169_v20 = vmul.f32 128.0, %v166_v18  ;;  %v181_v22 = vsub.f32 %v166_v18, %v180_v19 }
 0x152   : > { %v170_v21 = vsub.f32 %v169_v20, %v168_v13  ;;  %v202_v25 = vsel %vm189_vm3, %v181_v22, 0.0 }
 0x153   : > { %v203_v26 = vsel %vm191_vm4, %v202_v25, 0.0 }
 0x154   : > { %v190_v23 = vsel %vm187_vm2, %v170_v21, 0.0 }
 0x155   : > { %v192_v24 = vsel %vm191_vm4, %v190_v23, 0.0 }
 0x156   : > { %193 = vadd.xlane.f32.xlu1 %v192_v24 }
 0x15a   : > { %204 = vadd.xlane.f32.xlu1 %v203_v26 }
 0x1df   : > { %v194_v27 = vpop.xlane.xlu1 %193 }
 0x1e0   : > { %v195_v28 = vrot.slane %v194_v27, 4 }
 0x1e2   : > { %v196_v29 = vadd.f32 %v195_v28, %v194_v27 }
 0x1e3   : > { %v205_v30 = vpop.xlane.xlu1 %204 }
 0x1e4   : > { %v197_v31 = vrot.slane %v196_v29, 2  ;;  %v206_v32 = vrot.slane %v205_v30, 4 }
 0x1e6   : > { %v207_v33 = vadd.f32 %v206_v32, %v205_v30  ;;  %v198_v34 = vadd.f32 %v197_v31, %v196_v29 }
 0x1e8   : > { %v208_v35 = vrot.slane %v207_v33, 2  ;;  %v199_v36 = vrot.slane %v198_v34, 1 }
 0x1ea   : > { %v209_v37 = vadd.f32 %v208_v35, %v207_v33  ;;  %v200_v38 = vadd.f32 %v199_v36, %v198_v34 }
 0x1ec   : > { %320 = vpush %v200_v38  ;;  %v210_v39 = vrot.slane %v209_v37, 1 }
 0x1ee   : > { %v211_v40 = vadd.f32 %v210_v39, %v209_v37 }
 0x1f0   : > { %322 = vpush %v211_v40 }
 0x21d   : > { %s321_s5 = spop %320 }
 0x21e   : > { %v220_v42 = vstv %s321_s5 }
 0x221   : > { %s323_s8 = spop %322 }
 0x222   : > { %v218_v41 = vstv %s323_s8 }
 0x223   : > { %v219_v43 = vsel %vm217_vm8, %v218_v41, 0.0 }
 0x224   : > { %v221_v44 = vsel %vm215_vm9, %v220_v42, %v219_v43 }
 0x225   : > { %222 = vst [vmem:[%s147_s6] sm:$0xff] %v221_v44 }
 0x226   : > { %382 = shalt.err (!%p379_p3)
}
 0x227   : > { %s383_s25 = scalar_lea.hbm %s510_s17, 128  ;;  %s387_s28 = scalar_lea.hbm %s547_s2, 384 }
 0x228   : > { %p384_p4 = scmp.ne.s32.totalorder %s510_s17, %s383_s25  ;;  %p388_p9 = scmp.lt.s32.totalorder %s510_s17, %s547_s2 }
 0x229   : > { %p389_p10 = scmp.lt.s32.totalorder %s387_s28, %s383_s25 }
 0x22a   : > { %p385_p7 = pnand %p384_p4, %p486_p5 }
 0x22b   : > { %p390_p11 = por %p389_p10, %p388_p9 }
 0x22c   : > { %p386_p8 = pneg %p385_p7 }
 0x22e   : > { %p391_p12 = pnand %p390_p11, %p386_p8 }
 0x230   : > { %394 = shalt.err (!%p391_p12)
}
 0x231   : > { %324 = dma.vmem_to_hbm [thread:$0]  (%p486_p5), %s238_s7, 128, %s510_s17, %s224_s21  }
 0x232 PF: > { %p330_p13 = scmp.ge.s32.totalorder %s429_s12, 2  ;;  %s249_s3 = sand.u32 1, %s417_s9  }
 0x233   : > { %s250_s4 = scalar_lea.sflag [#allocation3], %s249_s3 }
 0x234   : > { %p327_p0 = pnand %p330_p13, %p490_p6 }
 0x236   : > { %p328_p1 = pneg %p327_p0 }
 0x238   : > { %412 = dma.done.wait (%p328_p1), %s250_s4, 128  }
 0x239   : > { %414 = vsyncadd (%p328_p1), %s250_s4, 4294967168  ;;  %p12_p2 = scmp.ge.s32.totalorder %s473_s15, 5   ;;  %s550_s9 = smov %s421_s10 }
 0x23a   : > { %s551_s10 = smov %s425_s11  ;;  %s552_s11 = smov %s484_s18 }
 0x23b   : > { %s553_s12 = smov %s473_s15  ;;  %14 = sbr.rel (!%p12_p2) target bundleno = 3 (0x3), region = 66 }
 0x240   :  { %255 = vsyncpa [#allocation3], 1 }
 0x241   :  { %257 = vsyncpa [#allocation3 + $0x1], 1 }

</bundles_post_ra>
